<compile_context>
chip_gen: v7x
topology: tpu7x:2x2x1
jax: 0.10.0
libtpu: 0.0.40
codegen_flags: <defaults>
</compile_context>

<pallas_src>
import math

import jax
import jax.numpy as jnp
from jax.experimental import pallas as pl
from jax.experimental.pallas import tpu as pltpu


def _round_up(x, m):
    return ((x + m - 1) // m) * m


# --------------------------------------------------------------------------- #
# Kernels: grid = (M, N, K); K (reduction) is the last, "arbitrary" axis.
# The output tile (same block index for every k) stays resident in VMEM, so we
# accumulate into o_ref directly (output dtype is f32).
# --------------------------------------------------------------------------- #
def _linear_bias_kernel(x_ref, w_ref, b_ref, o_ref):
    k = pl.program_id(2)
    part = jnp.dot(x_ref[...], w_ref[...], preferred_element_type=jnp.float32)

    @pl.when(k == 0)
    def _():
        o_ref[...] = part.astype(o_ref.dtype)

    @pl.when(k != 0)
    def _():
        o_ref[...] += part.astype(o_ref.dtype)

    @pl.when(k == pl.num_programs(2) - 1)
    def _():
        # bias is pre-scaled by b_mul at prep time; (1, tn) broadcasts over tm.
        o_ref[...] += b_ref[...].astype(o_ref.dtype)


def _linear_nobias_kernel(x_ref, w_ref, o_ref):
    k = pl.program_id(2)
    part = jnp.dot(x_ref[...], w_ref[...], preferred_element_type=jnp.float32)

    @pl.when(k == 0)
    def _():
        o_ref[...] = part.astype(o_ref.dtype)

    @pl.when(k != 0)
    def _():
        o_ref[...] += part.astype(o_ref.dtype)


# --------------------------------------------------------------------------- #
# One-time operand prep (cache these; do NOT redo per forward call).
# --------------------------------------------------------------------------- #
def _choose_tiles(in_features, out_features, *, max_tk=1024, max_tn=512):
    tk = min(_round_up(in_features, 128), max_tk)
    tn = min(_round_up(out_features, 128), max_tn)
    op128 = _round_up(out_features, 128)
    if op128 >= 256 and _round_up(out_features, tn) == tn:
        # N axis would be a single tile: split it so the "parallel" N axis has
        # extent >= 2 (keeps both v7x TensorCores busy; free on v5e/v6e).
        tn = _round_up(op128 // 2, 128)
    return tk, tn


def prepare_weight(weight, w_mul, tk, tn):
    """(O, I) -> w_mul-scaled, transposed, zero-padded (Ip, Op) RHS."""
    O, I = weight.shape
    Ip = _round_up(I, tk)
    Op = _round_up(O, tn)
    w_t = jnp.transpose(weight.astype(jnp.float32) * jnp.float32(w_mul))
    if (Ip, Op) != (I, O):
        w_t = jnp.pad(w_t, ((0, Ip - I), (0, Op - O)))
    return w_t


def prepare_bias(bias, b_mul, tn):
    """(O,) -> b_mul-scaled, zero-padded (1, Op) row."""
    O = bias.shape[0]
    Op = _round_up(O, tn)
    b = (bias.astype(jnp.float32) * jnp.float32(b_mul)).reshape(1, O)
    if Op != O:
        b = jnp.pad(b, ((0, 0), (0, Op - O)))
    return b


# --------------------------------------------------------------------------- #
# Forward on prepared operands.
# --------------------------------------------------------------------------- #
def my_linear_prepared(x, w_prepared, b_prepared, out_features, *, tk, tn,
                       max_tm=512):
    orig_shape = x.shape
    in_features = orig_shape[-1]
    x2 = x.reshape(-1, in_features).astype(jnp.float32)
    B = x2.shape[0]
    Ip, Op = w_prepared.shape
    assert Ip % tk == 0 and Op % tn == 0

    tm = min(_round_up(B, 8), max_tm)
    Bp = _round_up(B, tm)
    if (Bp, Ip) != (B, in_features):
        # Zero-padding K columns contributes 0 to the matmul; padded rows/cols
        # are sliced off below.
        x2 = jnp.pad(x2, ((0, Bp - B), (0, Ip - in_features)))

    grid = (Bp // tm, Op // tn, Ip // tk)

    x_spec = pl.BlockSpec((tm, tk), lambda i, j, k: (i, k))
    w_spec = pl.BlockSpec((tk, tn), lambda i, j, k: (k, j))
    out_spec = pl.BlockSpec((tm, tn), lambda i, j, k: (i, j))

    cost = pl.CostEstimate(
        flops=2 * Bp * Ip * Op,
        transcendentals=0,
        bytes_accessed=4 * (Bp * Ip + Ip * Op + Bp * Op),
    )
    cparams = pltpu.CompilerParams(
        dimension_semantics=("parallel", "parallel", "arbitrary"),
        vmem_limit_bytes=32 * 1024 * 1024,
    )

    if b_prepared is not None:
        kernel = _linear_bias_kernel
        in_specs = [x_spec, w_spec, pl.BlockSpec((1, tn), lambda i, j, k: (0, j))]
        operands = (x2, w_prepared, b_prepared)
    else:
        kernel = _linear_nobias_kernel
        in_specs = [x_spec, w_spec]
        operands = (x2, w_prepared)

    out_p = pl.pallas_call(
        kernel,
        out_shape=jax.ShapeDtypeStruct((Bp, Op), jnp.float32),
        grid_spec=pltpu.PrefetchScalarGridSpec(
            num_scalar_prefetch=0,
            grid=grid,
            in_specs=in_specs,
            out_specs=out_spec,
        ),
        compiler_params=cparams,
        cost_estimate=cost,
    )(*operands)

    out = out_p[:B, :out_features]
    return out.reshape(*orig_shape[:-1], out_features)


# --------------------------------------------------------------------------- #
# Parameter container mirroring MyLinear.__init__, with cached prepped operands.
# --------------------------------------------------------------------------- #
class MyLinearParams:
    """Deterministic parameter construction mirroring MyLinear.__init__."""

    def __init__(self, key, input_size, output_size, gain=2 ** 0.5,
                 use_wscale=False, lrmul=1.0, bias=True,
                 max_tk=1024, max_tn=512):
        he_std = gain * input_size ** (-0.5)
        if use_wscale:
            init_std = 1.0 / lrmul
            self.w_mul = he_std * lrmul
        else:
            init_std = he_std / lrmul
            self.w_mul = lrmul
        self.in_features = input_size
        self.out_features = output_size
        k_w, _ = jax.random.split(key)
        self.weight = (jax.random.normal(k_w, (output_size, input_size),
                                         dtype=jnp.float32) * init_std)
        if bias:
            self.bias = jnp.zeros((output_size,), dtype=jnp.float32)
            self.b_mul = lrmul
        else:
            self.bias = None
            self.b_mul = None
        self._max_tk = max_tk
        self._max_tn = max_tn
        self.refresh()

    def refresh(self):
        """Re-derive cached (scaled/transposed/padded) kernel operands.
        Call after mutating .weight / .bias / multipliers."""
        self.tk, self.tn = _choose_tiles(self.in_features, self.out_features,
                                         max_tk=self._max_tk,
                                         max_tn=self._max_tn)
        self._w_prep = prepare_weight(self.weight, self.w_mul, self.tk, self.tn)
        self._b_prep = (prepare_bias(self.bias, self.b_mul, self.tn)
                        if self.bias is not None else None)

    def __call__(self, x):
        return my_linear_prepared(x, self._w_prep, self._b_prep,
                                  self.out_features, tk=self.tk, tn=self.tn)


if __name__ == "__main__":
    key = jax.random.PRNGKey(0)
    k_x1, k_p1, k_b1, k_x2, k_p2, k_x3, k_p3, k_b3 = jax.random.split(key, 8)
    hi = jax.lax.Precision.HIGHEST

    # ---- case 1: bias + use_wscale, small aligned-ish shapes (8, 32) -> 64 --
    x1 = jax.random.normal(k_x1, (8, 32), dtype=jnp.float32)
    layer1 = MyLinearParams(k_p1, 32, 64, gain=math.sqrt(2.0),
                            use_wscale=True, lrmul=0.5, bias=True)
    # Give the (zero-initialized) bias nonzero values, then refresh the cache.
    layer1.bias = jax.random.normal(k_b1, (64,), dtype=jnp.float32)
    layer1.refresh()
    out1 = jax.block_until_ready(layer1(x1))
    ref1 = (jnp.matmul(x1, (layer1.weight * layer1.w_mul).T, precision=hi)
            + layer1.bias * layer1.b_mul)
    assert out1.shape == (8, 64)
    assert jnp.allclose(out1, ref1, atol=1e-4, rtol=1e-4)

    # ---- case 2: no bias, unaligned shapes + leading batch dims -------------
    x2 = jax.random.normal(k_x2, (4, 5, 200), dtype=jnp.float32)
    layer2 = MyLinearParams(k_p2, 200, 100, use_wscale=False, lrmul=1.0,
                            bias=False)
    out2 = jax.block_until_ready(layer2(x2))
    ref2 = jnp.matmul(x2, (layer2.weight * layer2.w_mul).T, precision=hi)
    assert out2.shape == (4, 5, 100)
    assert jnp.allclose(out2, ref2, atol=1e-4, rtol=1e-4)

    # ---- case 3: force multi-step K reduction + split N axis ----------------
    x3 = jax.random.normal(k_x3, (16, 384), dtype=jnp.float32)
    layer3 = MyLinearParams(k_p3, 384, 256, gain=math.sqrt(2.0),
                            use_wscale=True, lrmul=1.0, bias=True,
                            max_tk=128)           # K grid = 3, N grid = 2
    layer3.bias = jax.random.normal(k_b3, (256,), dtype=jnp.float32)
    layer3.refresh()
    out3 = jax.block_until_ready(layer3(x3))
    ref3 = (jnp.matmul(x3, (layer3.weight * layer3.w_mul).T, precision=hi)
            + layer3.bias * layer3.b_mul)
    assert out3.shape == (16, 256)
    assert jnp.allclose(out3, ref3, atol=1e-4, rtol=1e-4)

    print("KERNEL_OK")
</pallas_src>

<mosaic_0001>
module attributes {stable_mosaic.version = 11 : i64} {
  func.func @_linear_bias_kernel(%arg0: i32, %arg1: i32, %arg2: i32, %arg3: memref<8x128xf32, #tpu.memory_space<vmem>>, %arg4: memref<128x128xf32, #tpu.memory_space<vmem>>, %arg5: memref<1x128xf32, #tpu.memory_space<vmem>>, %arg6: memref<8x128xf32, #tpu.memory_space<vmem>>) attributes {dimension_semantics = [#tpu.dimension_semantics<parallel>, #tpu.dimension_semantics<parallel>, #tpu.dimension_semantics<arbitrary>], iteration_bounds = array<i64: 1, 1, 1>, scalar_prefetch = 0 : i64, scratch_operands = 0 : i64, tpu.core_type = #tpu.core_type<tc>, window_params = [{transform_indices = @transform_0, window_bounds = array<i64: 8, 128>}, {transform_indices = @transform_1, window_bounds = array<i64: 128, 128>}, {transform_indices = @transform_2, window_bounds = array<i64: 1, 128>}, {transform_indices = @transform_3, window_bounds = array<i64: 8, 128>}]} {
    %c0 = arith.constant 0 : index
    %c0_0 = arith.constant 0 : index
    %0 = vector.load %arg3[%c0, %c0_0] : memref<8x128xf32, #tpu.memory_space<vmem>>, vector<8x128xf32>
    %c0_1 = arith.constant 0 : index
    %c0_2 = arith.constant 0 : index
    %1 = vector.load %arg4[%c0_1, %c0_2] : memref<128x128xf32, #tpu.memory_space<vmem>>, vector<128x128xf32>
    %cst = arith.constant dense<0.000000e+00> : vector<8x128xf32>
    %2 = tpu.matmul %0, %1, %cst {dimension_numbers = #tpu.dot_dimension_numbers<[1], [0], [0], [1], [0, 0, 1, 1], [], []>} : vector<8x128xf32>, vector<128x128xf32>, vector<8x128xf32> -> vector<8x128xf32>
    %c0_i32 = arith.constant 0 : i32
    %3 = arith.cmpi eq, %arg2, %c0_i32 : i32
    %4 = arith.extui %3 : i1 to i32
    %c0_i32_3 = arith.constant 0 : i32
    %5 = arith.cmpi ne, %4, %c0_i32_3 : i32
    scf.if %5 {
      %c0_8 = arith.constant 0 : index
      %c0_9 = arith.constant 0 : index
      %12 = vector.load %arg6[%c0_8, %c0_9] : memref<8x128xf32, #tpu.memory_space<vmem>>, vector<8x128xf32>
      tpu.vector_store %arg6[%c0_8, %c0_9], %2 {strides = array<i32>} : memref<8x128xf32, #tpu.memory_space<vmem>>, vector<8x128xf32>,
    } else {
    }
    %c0_i32_4 = arith.constant 0 : i32
    %6 = arith.cmpi ne, %arg2, %c0_i32_4 : i32
    %7 = arith.extui %6 : i1 to i32
    %c0_i32_5 = arith.constant 0 : i32
    %8 = arith.cmpi ne, %7, %c0_i32_5 : i32
    scf.if %8 {
      %c0_8 = arith.constant 0 : index
      %c0_9 = arith.constant 0 : index
      %12 = vector.load %arg6[%c0_8, %c0_9] : memref<8x128xf32, #tpu.memory_space<vmem>>, vector<8x128xf32>
      %13 = arith.addf %12, %2 : vector<8x128xf32>
      %c0_10 = arith.constant 0 : index
      %c0_11 = arith.constant 0 : index
      %14 = vector.load %arg6[%c0_10, %c0_11] : memref<8x128xf32, #tpu.memory_space<vmem>>, vector<8x128xf32>
      tpu.vector_store %arg6[%c0_10, %c0_11], %13 {strides = array<i32>} : memref<8x128xf32, #tpu.memory_space<vmem>>, vector<8x128xf32>,
    } else {
    }
    %c0_i32_6 = arith.constant 0 : i32
    %9 = arith.cmpi eq, %arg2, %c0_i32_6 : i32
    %10 = arith.extui %9 : i1 to i32
    %c0_i32_7 = arith.constant 0 : i32
    %11 = arith.cmpi ne, %10, %c0_i32_7 : i32
    scf.if %11 {
      %c0_8 = arith.constant 0 : index
      %c0_9 = arith.constant 0 : index
      %12 = vector.load %arg6[%c0_8, %c0_9] : memref<8x128xf32, #tpu.memory_space<vmem>>, vector<8x128xf32>
      %c0_10 = arith.constant 0 : index
      %c0_11 = arith.constant 0 : index
      %13 = vector.load %arg5[%c0_10, %c0_11] : memref<1x128xf32, #tpu.memory_space<vmem>>, vector<1x128xf32>
      %14 = vector.broadcast %13 : vector<1x128xf32> to vector<8x128xf32>
      %15 = arith.addf %12, %14 : vector<8x128xf32>
      %c0_12 = arith.constant 0 : index
      %c0_13 = arith.constant 0 : index
      %16 = vector.load %arg6[%c0_12, %c0_13] : memref<8x128xf32, #tpu.memory_space<vmem>>, vector<8x128xf32>
      tpu.vector_store %arg6[%c0_12, %c0_13], %15 {strides = array<i32>} : memref<8x128xf32, #tpu.memory_space<vmem>>, vector<8x128xf32>,
    } else {
    }
    return
  }
  func.func @transform_0(%arg0: i32, %arg1: i32, %arg2: i32) -> (i32, i32) {
    %c0_i32 = arith.constant 0 : i32
    return %arg0, %arg2 : i32, i32
  }
  func.func @transform_1(%arg0: i32, %arg1: i32, %arg2: i32) -> (i32, i32) {
    %c0_i32 = arith.constant 0 : i32
    return %arg2, %arg1 : i32, i32
  }
  func.func @transform_2(%arg0: i32, %arg1: i32, %arg2: i32) -> (i32, i32) {
    %c0_i32 = arith.constant 0 : i32
    %c0_i32_0 = arith.constant 0 : i32
    return %c0_i32, %arg1 : i32, i32
  }
  func.func @transform_3(%arg0: i32, %arg1: i32, %arg2: i32) -> (i32, i32) {
    %c0_i32 = arith.constant 0 : i32
    return %arg0, %arg1 : i32, i32
  }
}

</mosaic_0001>

<bundles_post_ra>
// kernel: tpu_custom_call.1
= control target key start
LH: loop header
LB: loop body
LE: loop exit
PB: predicated region body
PF: predicated region fallthrough
CT: control target
= control target key end

     0   :  { %8 = vsyncpa [#allocation3], 0  ;;  %s400_s0 = inlined_call_operand.hbm [shape: f32[8,128], index: 0, kind: input, shape index: {}]   ;;  %s401_s1 = inlined_call_operand.hbm [shape: f32[128,128], index: 1, kind: input, shape index: {}]   ;;  %s402_s2 = inlined_call_operand.vmem [shape: f32[1,128], index: 2, kind: input, shape index: {}]   ;;  %s403_s3 = inlined_call_operand.hbm [shape: f32[8,128], index: 3, kind: output, shape index: {}]  }
   0x1   :  { %9 = vsyncpa [#allocation6], 0 }
   0x2   :  { %10 = vsyncpa [#allocation4], 0  ;;  %s326_s12 = smov [#allocation2]   ;;  %s327_s14 = smov [#allocation5]  }
   0x3   :  { %s17_s13 = sshll.u32 %s326_s12, 4  ;;  %s26_s15 = sshll.u32 %s327_s14, 4  ;;  %s18_s13 = int_to_ptr.vmem [resolvable:$true] %s17_s13  ;;  %s354_s15 = int_to_ptr.vmem [resolvable:$true] %s26_s15 }
   0x4   :  { %s254_s18 = scalar_lea.hbm %s400_s0, 128 }
   0x5   :  { %p255_p0 = scmp.ne.s32.totalorder %s400_s0, %s254_s18  ;;  %p258_p1 = scmp.lt.u32.totalorder %s254_s18, %s400_s0 }
   0x7   :  { %p260_p2 = pnand %p258_p1, %p255_p0 }
   0x9   :  { %263 = shalt.err (!%p260_p2)
}
   0xa   :  { %s264_s23 = scalar_lea.vmem %s18_s13, 128  ;;  %p269_p4 = scmp.lt.s32.totalorder %s18_s13, %s18_s13 }
   0xb   :  { %p265_p3 = scmp.ne.s32.totalorder %s18_s13, %s264_s23  ;;  %p270_p5 = scmp.lt.s32.totalorder %s264_s23, %s264_s23 }
   0xd   :  { %p271_p6 = por %p270_p5, %p269_p4 }
   0xf   :  { %p272_p7 = pnand %p271_p6, %p265_p3 }
  0x11   :  { %275 = shalt.err (!%p272_p7)
}
  0x12   :  { %20 = dma.hbm_to_vmem [thread:$0]  %s400_s0, 128, %s18_s13, [#allocation3]  }
  0x13   :  { %s276_s28 = scalar_lea.hbm %s401_s1, 2048 }
  0x14   :  { %p277_p8 = scmp.ne.s32.totalorder %s401_s1, %s276_s28  ;;  %p280_p9 = scmp.lt.u32.totalorder %s276_s28, %s401_s1 }
  0x16   :  { %p282_p10 = pnand %p280_p9, %p277_p8 }
  0x18   :  { %285 = shalt.err (!%p282_p10)
}
  0x19   :  { %s286_s6 = scalar_lea.vmem %s354_s15, 2048  ;;  %p291_p12 = scmp.lt.s32.totalorder %s354_s15, %s354_s15 }
  0x1a   :  { %p287_p11 = scmp.ne.s32.totalorder %s354_s15, %s286_s6  ;;  %p292_p13 = scmp.lt.s32.totalorder %s286_s6, %s286_s6 }
  0x1c   :  { %p293_p0 = por %p292_p13, %p291_p12 }
  0x1e   :  { %p294_p1 = pnand %p293_p0, %p287_p11 }
  0x20   :  { %297 = shalt.err (!%p294_p1)
}
  0x21   :  { %s328_s0 = smov 128   ;;  %s329_s7 = smov 8  }
  0x22   :  { %32 = dma.hbm_to_vmem [thread:$0]  %s401_s1, 2048, %s354_s15, [#allocation6], %s328_s0, %s328_s0, %s329_s7  }
  0x23   :  { %320 = dma.done.wait [#allocation3], 128  }
  0x24   :  { %321 = vsyncadd [#allocation3], 4294967168 }
  0x25   :  { %322 = dma.done.wait [#allocation6], 2048  }
  0x26   :  { %323 = vsyncadd [#allocation6], 4294965248  ;;  %v330_v0 = vmov 0.0|0.0   ;;  %vm331_vm0 = vmmov 0   ;;  %v332_v1 = vmov 0.0   ;;  %v42_v2 = vld [vmem:[#allocation5] sm:$0xff] }
  0x27   :  { %222 = vmatprep.subr.bf16.mxu0 %v330_v0  ;;  %219 = vmatprep.mubr.msk.f32.mxu0 %vm331_vm0, %v332_v1  ;;  %v43_v3 = vld [vmem:[#allocation5 + $0x8] sm:$0xff]  ;;  %v44_v4 = vld [vmem:[#allocation5 + $0x10] sm:$0xff]  ;;  %v45_v6 = vld [vmem:[#allocation5 + $0x18] sm:$0xff]  ;;  %s333_s11 = smov [#allocation7]  }
  0x28   :  { %v223_v5 = vpack.c.bf16 %v43_v3, %v42_v2  ;;  %v226_v7 = vpack.c.bf16 %v45_v6, %v44_v4  ;;  %v46_v8 = vld [vmem:[#allocation5 + $0x20] sm:$0xff]  ;;  %v47_v9 = vld [vmem:[#allocation5 + $0x28] sm:$0xff]  ;;  %v48_v11 = vld [vmem:[#allocation5 + $0x30] sm:$0xff]  ;;  %s159_s12 = sshll.u32 %s333_s11, 4  ;;  %s160_s12 = int_to_ptr.vmem [resolvable:$true] %s159_s12 }
  0x29   :  { %v229_v10 = vpack.c.bf16 %v47_v9, %v46_v8  ;;  %v49_v12 = vld [vmem:[#allocation5 + $0x38] sm:$0xff]  ;;  %v50_v14 = vld [vmem:[#allocation5 + $0x40] sm:$0xff]  ;;  %v51_v15 = vld [vmem:[#allocation5 + $0x48] sm:$0xff]  ;;  %s298_s13 = scalar_lea.vmem %s160_s12, 128  ;;  %p303_p3 = scmp.lt.s32.totalorder %s160_s12, %s160_s12 }
  0x2a   :  { %224 = vmatpush3.bf16.msra.mxu0 %v223_v5  ;;  %v232_v13 = vpack.c.bf16 %v49_v12, %v48_v11  ;;  %v235_v16 = vpack.c.bf16 %v51_v15, %v50_v14  ;;  %v52_v17 = vld [vmem:[#allocation5 + $0x50] sm:$0xff]  ;;  %v53_v18 = vld [vmem:[#allocation5 + $0x58] sm:$0xff]  ;;  %v54_v20 = vld [vmem:[#allocation5 + $0x60] sm:$0xff]  ;;  %p299_p2 = scmp.ne.s32.totalorder %s160_s12, %s298_s13  ;;  %p304_p4 = scmp.lt.s32.totalorder %s298_s13, %s298_s13 }
  0x2b   :  { %225 = vmatprep.subr.bf16.mxu0 %v330_v0  ;;  %v238_v19 = vpack.c.bf16 %v53_v18, %v52_v17  ;;  %v55_v21 = vld [vmem:[#allocation5 + $0x68] sm:$0xff]  ;;  %v56_v23 = vld [vmem:[#allocation5 + $0x70] sm:$0xff]  ;;  %v57_v24 = vld [vmem:[#allocation5 + $0x78] sm:$0xff] }
  0x2c   :  { %v241_v22 = vpack.c.bf16 %v55_v21, %v54_v20  ;;  %v244_v25 = vpack.c.bf16 %v57_v24, %v56_v23  ;;  %v41_v26 = vld [vmem:[#allocation2] sm:$0xff]  ;;  %p305_p5 = por %p304_p4, %p303_p3 }
  0x2d   :  { %v169_v27 = vld [vmem:[%s402_s2] ss:$0 sm:$0xff] }
  0x2e   :  { %227 = vmatpush3.bf16.msra.mxu0 %v226_v7  ;;  %p306_p6 = pnand %p305_p5, %p299_p2 }
  0x2f   :  { %228 = vmatprep.subr.bf16.mxu0 %v330_v0 }
  0x32   :  { %230 = vmatpush3.bf16.msra.mxu0 %v229_v10 }
  0x33   :  { %231 = vmatprep.subr.bf16.mxu0 %v330_v0 }
  0x36   :  { %233 = vmatpush3.bf16.msra.mxu0 %v232_v13 }
  0x37   :  { %234 = vmatprep.subr.bf16.mxu0 %v330_v0 }
  0x3a   :  { %236 = vmatpush3.bf16.msra.mxu0 %v235_v16 }
  0x3b   :  { %237 = vmatprep.subr.bf16.mxu0 %v330_v0 }
  0x3e   :  { %239 = vmatpush3.bf16.msra.mxu0 %v238_v19 }
  0x3f   :  { %240 = vmatprep.subr.bf16.mxu0 %v330_v0 }
  0x42   :  { %242 = vmatpush3.bf16.msra.mxu0 %v241_v22 }
  0x43   :  { %243 = vmatprep.subr.bf16.mxu0 %v330_v0 }
  0x46   :  { %245 = vmatpush3.bf16.msra.mxu0 %v244_v25 }
  0x49   :  { %220 = vmatmul.mubr.f32.vlgmr.msra.gmra.mrb[0].mxu0 %v41_v26 }
 0x11c   :  { %v124_v28 = vpop.f32.mrb[0].mxu0 }
 0x11d   :  { %v221_v29 = vpop.f32.mrb[1].mxu0  ;;  %v151_v30 = vadd.f32 %v169_v27, %v124_v28 }
 0x11f   :  { %152 = vst [vmem:[#allocation7] sm:$0xff] %v151_v30 }
 0x120   :  { %309 = shalt.err (!%p306_p6)
}
 0x121   :  { %s310_s16 = scalar_lea.hbm %s403_s3, 128 }
 0x122   :  { %p311_p7 = scmp.ne.s32.totalorder %s403_s3, %s310_s16  ;;  %p314_p8 = scmp.lt.u32.totalorder %s310_s16, %s403_s3 }
 0x124   :  { %p316_p9 = pnand %p314_p8, %p311_p7 }
 0x126   :  { %319 = shalt.err (!%p316_p9)
}
 0x127   :  { %162 = dma.vmem_to_hbm [thread:$0]  %s160_s12, 128, %s403_s3, [#allocation4]  }
 0x128   :  { %324 = dma.done.wait [#allocation4], 128  }
 0x129   :  { %325 = vsyncadd [#allocation4], 4294967168 }
 0x12a   :  { %166 = vsyncpa [#allocation3], 1 }
 0x12b   :  { %167 = vsyncpa [#allocation6], 1 }
 0x12c   :  { %168 = vsyncpa [#allocation4], 1 }

</bundles_post_ra>
